<compile_context>
chip_gen: v7x
topology: tpu7x:2x2x1
jax: 0.10.0
libtpu: 0.0.40
codegen_flags: <defaults>
</compile_context>

<pallas_src>
import functools

import jax
import jax.numpy as jnp
from jax.experimental import pallas as pl
from jax.experimental.pallas import tpu as pltpu


def _round_up(x, m):
    return ((x + m - 1) // m) * m


# ----------------------------- kernel -------------------------------------- #

def _slice_scale_kernel(x_ref, o_ref, *, out_w, scale):
    # x_ref: (rt, ct_in) tile; o_ref: (rt, out_w) tile, out_w <= ct_in.
    if out_w == x_ref.shape[-1]:
        x = x_ref[...]                  # lane-dense fast path (no re-layout)
    else:
        x = x_ref[:, :out_w]            # small / lane-unaligned slice widths
    # Python-float `scale` is weakly typed: the multiply stays in x.dtype
    # (f32 stays f32, bf16 stays bf16), matching the PyTorch module; the
    # astype is a no-op for matching dtypes.
    o_ref[...] = (x * scale).astype(o_ref.dtype)


# ----------------------------- wrappers ------------------------------------ #

_LANE = 128
_SUBLANE = 8
_COL_TILE_MAX = 2048            # lane-dim tile cap (multiple of 128)


def _choose_row_tile(n_rows, ct_in, itemsize, block_bytes):
    rows = max(1, block_bytes // max(ct_in * itemsize, 1))
    if rows >= n_rows:
        return n_rows                                   # full dim: legal
    rows = max(_SUBLANE, (rows // _SUBLANE) * _SUBLANE) # sublane-aligned
    return min(rows, n_rows)


def _first_channel_2d(x, k, scale, *, block_bytes=1 << 20):
    """out = scale * x[:, :k] for a 2-D array x of shape (N, F)."""
    N, F = x.shape
    assert 0 < k <= F
    itemsize = jnp.dtype(x.dtype).itemsize

    if k % _LANE == 0:
        # Lane-aligned slice: read exactly the kept columns, tile them.
        ct_out = min(k, _COL_TILE_MAX)
        ct_in = ct_out
    else:
        # Unaligned (small) slice: read a lane-aligned superset of [0, k)
        # (at most one extra 128-wide lane group), slice to k in-kernel.
        ct_out = k                              # == full output dim -> legal
        ct_in = min(F, _round_up(k, _LANE))     # mult of 128 or == F -> legal

    n_col = pl.cdiv(k, ct_out)
    rt = _choose_row_tile(N, ct_in, itemsize, block_bytes)
    n_row = pl.cdiv(N, rt)

    kernel = functools.partial(_slice_scale_kernel, out_w=ct_out, scale=scale)

    return pl.pallas_call(
        kernel,
        out_shape=jax.ShapeDtypeStruct((N, k), x.dtype),
        grid_spec=pltpu.PrefetchScalarGridSpec(
            num_scalar_prefetch=0,
            grid=(n_row, n_col),
            in_specs=[pl.BlockSpec((rt, ct_in), lambda r, c: (r, c))],
            out_specs=pl.BlockSpec((rt, ct_out), lambda r, c: (r, c)),
        ),
        compiler_params=pltpu.CompilerParams(
            dimension_semantics=("parallel", "parallel")),
    )(x)


def first_channel(x, cout, scale=1.0, *, block_bytes=1 << 20):
    """Pallas equivalent of FirstChannel.forward (rank-dispatched)."""
    if x.ndim == 4:
        N, C, H, W = x.shape
        assert cout <= C
        # Flatten (C, H, W) into columns: the first `cout` channels are the
        # first cout*H*W contiguous columns, so the channel slice is
        # expressed purely through the BlockSpecs (no dropped-channel DMA)
        # and the output's lane dim is H*W-dense.
        x2 = x.reshape(N, C * H * W)
        out2 = _first_channel_2d(x2, cout * H * W, scale,
                                 block_bytes=block_bytes)
        return out2.reshape(N, cout, H, W)
    elif x.ndim == 2:
        N, F = x.shape
        assert cout <= F
        return _first_channel_2d(x, cout, scale, block_bytes=block_bytes)
    else:
        raise ValueError(f"unsupported rank {x.ndim}")


# ------------------------------- main -------------------------------------- #

if __name__ == "__main__":
    key = jax.random.PRNGKey(0)
    k4, k2, k3 = jax.random.split(key, 3)

    scale = 0.7

    # 4D case: N=2, C=4, H=W=16 (NCHW, matching PyTorch conv convention).
    cout = 2
    x4 = jax.random.normal(k4, (2, 4, 16, 16), dtype=jnp.float32)
    out4 = jax.block_until_ready(first_channel(x4, cout, scale))
    ref4 = scale * x4[:, :cout, :, :]
    assert out4.shape == ref4.shape and out4.dtype == ref4.dtype
    assert jnp.allclose(out4, ref4, atol=1e-6, rtol=1e-6)

    # 2D case with a small, lane-unaligned cout: N=2, F=32, cout=3.
    x2 = jax.random.normal(k2, (2, 32), dtype=jnp.float32)
    out2 = jax.block_until_ready(first_channel(x2, 3, scale))
    ref2 = scale * x2[:, :3]
    assert out2.shape == ref2.shape and out2.dtype == ref2.dtype
    assert jnp.allclose(out2, ref2, atol=1e-6, rtol=1e-6)

    # 2D case exercising row tiling with a partial edge block:
    # N=20 rows (row tile 8 -> 3 row blocks, last partial), cout=128 columns.
    x3 = jax.random.normal(k3, (20, 256), dtype=jnp.float32)
    out3 = jax.block_until_ready(first_channel(x3, 128, scale,
                                               block_bytes=4096))
    ref3 = scale * x3[:, :128]
    assert out3.shape == ref3.shape and out3.dtype == ref3.dtype
    assert jnp.allclose(out3, ref3, atol=1e-6, rtol=1e-6)

    print("KERNEL_OK")
</pallas_src>

<mosaic_0001>
module attributes {stable_mosaic.version = 11 : i64} {
  func.func @_slice_scale_kernel(%arg0: i32, %arg1: i32, %arg2: memref<2x512xf32, #tpu.memory_space<vmem>>, %arg3: memref<2x512xf32, #tpu.memory_space<vmem>>) attributes {dimension_semantics = [#tpu.dimension_semantics<parallel>, #tpu.dimension_semantics<parallel>], iteration_bounds = array<i64: 1, 1>, scalar_prefetch = 0 : i64, scratch_operands = 0 : i64, tpu.core_type = #tpu.core_type<tc>, window_params = [{transform_indices = @transform_0, window_bounds = array<i64: 2, 512>}, {transform_indices = @transform_1, window_bounds = array<i64: 2, 512>}]} {
    %c0 = arith.constant 0 : index
    %c0_0 = arith.constant 0 : index
    %0 = vector.load %arg2[%c0, %c0_0] : memref<2x512xf32, #tpu.memory_space<vmem>>, vector<2x512xf32>
    %cst = arith.constant 0.699999988 : f32
    %1 = vector.broadcast %cst : f32 to vector<2x512xf32>
    %2 = arith.mulf %0, %1 : vector<2x512xf32>
    %c0_1 = arith.constant 0 : index
    %c0_2 = arith.constant 0 : index
    %3 = vector.load %arg3[%c0_1, %c0_2] : memref<2x512xf32, #tpu.memory_space<vmem>>, vector<2x512xf32>
    tpu.vector_store %arg3[%c0_1, %c0_2], %2 {strides = array<i32>} : memref<2x512xf32, #tpu.memory_space<vmem>>, vector<2x512xf32>,
    return
  }
  func.func @transform_0(%arg0: i32, %arg1: i32) -> (i32, i32) {
    %c0_i32 = arith.constant 0 : i32
    return %arg0, %arg1 : i32, i32
  }
  func.func @transform_1(%arg0: i32, %arg1: i32) -> (i32, i32) {
    %c0_i32 = arith.constant 0 : i32
    return %arg0, %arg1 : i32, i32
  }
}

</mosaic_0001>

<bundles_post_ra>
// kernel: tpu_custom_call.1
= control target key start
LH: loop header
LB: loop body
LE: loop exit
PB: predicated region body
PF: predicated region fallthrough
CT: control target
= control target key end

     0   :  { %6 = vsyncpa [#allocation3], 0  ;;  %s128_s0 = inlined_call_operand.hbm [shape: f32[2,1024], index: 0, kind: input, shape index: {}]   ;;  %s129_s1 = inlined_call_operand.hbm [shape: f32[2,512], index: 1, kind: output, shape index: {}]  }
   0x1   :  { %7 = vsyncpa [#allocation4], 0  ;;  %s89_s6 = smov [#allocation2]   ;;  %s41_s10 = scalar_lea.hbm %s128_s0, 128 }
   0x2   :  { %s14_s7 = sshll.u32 %s89_s6, 4  ;;  %p42_p0 = scmp.ne.s32.totalorder %s128_s0, %s41_s10  ;;  %s15_s7 = int_to_ptr.vmem [resolvable:$true] %s14_s7 }
   0x3   :  { %s43_s15 = scalar_lea.hbm %s128_s0, 256  ;;  %p45_p2 = scmp.lt.u32.totalorder %s41_s10, %s128_s0 }
   0x4   :  { %p44_p1 = scmp.lt.u32.totalorder %s43_s15, %s41_s10 }
   0x6   :  { %p46_p3 = por %p45_p2, %p44_p1 }
   0x8   :  { %p47_p4 = pnand %p46_p3, %p42_p0 }
   0xa   :  { %50 = shalt.err (!%p47_p4)
}
   0xb   :  { %s51_s18 = scalar_lea.vmem %s15_s7, 128  ;;  %p56_p6 = scmp.lt.s32.totalorder %s15_s7, %s15_s7 }
   0xc   :  { %p52_p5 = scmp.ne.s32.totalorder %s15_s7, %s51_s18  ;;  %p57_p7 = scmp.lt.s32.totalorder %s51_s18, %s51_s18 }
   0xe   :  { %p58_p8 = por %p57_p7, %p56_p6 }
  0x10   :  { %p59_p9 = pnand %p58_p8, %p52_p5 }
  0x12   :  { %62 = shalt.err (!%p59_p9)
}
  0x13   :  { %17 = dma.hbm_to_vmem [thread:$0]  %s128_s0, 128, %s15_s7, [#allocation3]  }
  0x14   :  { %85 = dma.done.wait [#allocation3], 128  }
  0x15   :  { %86 = vsyncadd [#allocation3], 4294967168  ;;  %s90_s21 = smov [#allocation5]   ;;  %v21_v0 = vld [vmem:[#allocation2] sm:$0xff] }
  0x16   :  { %s30_s22 = sshll.u32 %s90_s21, 4  ;;  %v22_v1 = vmul.f32 0.7, %v21_v0  ;;  %s31_s22 = int_to_ptr.vmem [resolvable:$true] %s30_s22 }
  0x17   :  { %s63_s23 = scalar_lea.vmem %s31_s22, 128  ;;  %p68_p11 = scmp.lt.s32.totalorder %s31_s22, %s31_s22 }
  0x18   :  { %23 = vst [vmem:[#allocation5] sm:$0xff] %v22_v1  ;;  %p64_p10 = scmp.ne.s32.totalorder %s31_s22, %s63_s23  ;;  %p69_p12 = scmp.lt.s32.totalorder %s63_s23, %s63_s23 }
  0x1a   :  { %p70_p13 = por %p69_p12, %p68_p11 }
  0x1c   :  { %p71_p0 = pnand %p70_p13, %p64_p10 }
  0x1e   :  { %74 = shalt.err (!%p71_p0)
}
  0x1f   :  { %s75_s26 = scalar_lea.hbm %s129_s1, 128 }
  0x20   :  { %p76_p1 = scmp.ne.s32.totalorder %s129_s1, %s75_s26  ;;  %p79_p2 = scmp.lt.u32.totalorder %s75_s26, %s129_s1 }
  0x22   :  { %p81_p3 = pnand %p79_p2, %p76_p1 }
  0x24   :  { %84 = shalt.err (!%p81_p3)
}
  0x25   :  { %33 = dma.vmem_to_hbm [thread:$0]  %s31_s22, 128, %s129_s1, [#allocation4]  }
  0x26   :  { %87 = dma.done.wait [#allocation4], 128  }
  0x27   :  { %88 = vsyncadd [#allocation4], 4294967168 }
  0x28   :  { %37 = vsyncpa [#allocation3], 1 }
  0x29   :  { %38 = vsyncpa [#allocation4], 1 }

</bundles_post_ra>
